<compile_context>
chip_gen: v7x
topology: tpu7x:2x2x1
jax: 0.10.0
libtpu: 0.0.40
codegen_flags: <defaults>
</compile_context>

<pallas_src>
import jax
import jax.numpy as jnp
from jax import lax
from jax.experimental import pallas as pl
from jax.experimental.pallas import tpu as pltpu


def _mha_kernel(x_ref, wqkv_ref, bqkv_ref, wproj_ref, bproj_ref, o_ref,
                k_scr, v_scr):
    # Shapes (Dp % 128 == 0, lane-dense loads/stores):
    #   x_ref     (bb, N, Dp)   bf16  (same block across the query axis -> resident)
    #   wqkv_ref  (Dp, 3*Dp)    bf16  fused [Wq*scale | Wk | Wv], single-buffered
    #   bqkv_ref  (1, 3*Dp)     f32   fused [bq*scale | bk | bv]
    #   wproj_ref (Dp, Dp)      bf16
    #   bproj_ref (1, Dp)       f32
    #   o_ref     (bb, tq, Dp)
    #   k_scr/v_scr (bb, N, Dp) bf16 scratch — K/V projections, computed once
    #                                          per batch block (at qi == 0).
    bb, tq, Dp = o_ref.shape
    qi = pl.program_id(1)

    # ---- K / V projections: once per batch block, kept resident in VMEM ----
    @pl.when(qi == 0)
    def _():
        x_all = x_ref[...]                                        # (bb, N, Dp) bf16
        # Fused (Dp, 2Dp) matmul keeps the MXU output dimension wide.
        kv = lax.dot_general(
            x_all, wqkv_ref[:, Dp:],
            dimension_numbers=(((2,), (0,)), ((), ())),
            preferred_element_type=jnp.float32)                   # (bb, N, 2Dp) f32
        kv = (kv + bqkv_ref[:, Dp:]).astype(jnp.bfloat16)         # cast once
        k_scr[...] = kv[..., :Dp]                                 # lane-aligned split
        v_scr[...] = kv[..., Dp:]

    # ---- Q projection for this query tile (scale pre-folded into Wq / bq) ----
    q_start = pl.multiple_of(qi * tq, tq)
    x_q = x_ref[:, pl.ds(q_start, tq), :]                         # (bb, tq, Dp) bf16
    q = lax.dot_general(
        x_q, wqkv_ref[:, :Dp],
        dimension_numbers=(((2,), (0,)), ((), ())),
        preferred_element_type=jnp.float32)
    q = (q + bqkv_ref[:, :Dp]).astype(jnp.bfloat16)               # cast once

    # ---- scores + numerically stable softmax in f32 ----
    s = jnp.einsum("bqd,bkd->bqk", q, k_scr[...],
                   preferred_element_type=jnp.float32)            # (bb, tq, N)
    s = s - jnp.max(s, axis=-1, keepdims=True)
    p = jnp.exp(s)
    inv_den = pl.reciprocal(jnp.sum(p, axis=-1, keepdims=True), approx=False)
    attn = (p * inv_den).astype(jnp.bfloat16)

    # ---- attn @ V, then output projection ----
    out = jnp.einsum("bqk,bkd->bqd", attn, v_scr[...],
                     preferred_element_type=jnp.float32)          # (bb, tq, Dp) f32
    out = lax.dot_general(
        out.astype(jnp.bfloat16), wproj_ref[...],
        dimension_numbers=(((2,), (0,)), ((), ())),
        preferred_element_type=jnp.float32)
    o_ref[...] = (out + bproj_ref[...]).astype(o_ref.dtype)


def _round_up(x, m):
    return (x + m - 1) // m * m


def _pick_block_q(N):
    # One query tile unless N is large; a sub-tile must divide N and be a
    # multiple of 8 (sublane) — otherwise fall back to the monolithic tile.
    if N <= 512:
        return N
    for cand in range(min(512, N), 7, -1):
        if N % cand == 0 and cand % 8 == 0:
            return cand
    return N


def _pick_block_b(B, N, Dp, tq, out_itemsize):
    # Fill the MXU M dimension (~512 rows), keep >=2 parallel grid steps when
    # B allows (v7x has 2 TensorCores), and respect a rough per-step VMEM
    # budget (x double-buffer + K/V scratch + f32 scores + output buffers).
    target_rows = 512
    bb = max(1, min(B, target_rows // max(N, 1)))
    while B % bb:
        bb -= 1
    if B // bb < 2 <= B:
        bb = max(1, B // 2)
        while B % bb:
            bb -= 1

    def footprint(b):
        x_bytes = 2 * b * N * Dp * 2           # double-buffered bf16 input
        kv_bytes = 2 * b * N * Dp * 2          # K + V scratch (bf16)
        s_bytes = b * tq * N * 4               # f32 scores / probs
        o_bytes = 2 * b * tq * Dp * out_itemsize
        return x_bytes + kv_bytes + s_bytes + o_bytes

    budget = 40 * 1024 * 1024
    while bb > 1 and footprint(bb) > budget:
        bb -= 1
        while B % bb:
            bb -= 1
    return bb


def multi_head_forward(x, w_qkv, b_qkv, w_proj, b_proj, *, head_num,
                       block_b=None, block_q=None):
    """x: (B, N, D). w_qkv: (D, 3D). b_qkv: (1, 3D). w_proj: (D, D). b_proj: (1, D).

    Weights are in (in, out) layout (transposed nn.Linear.weight).
    NOTE: mirrors the reference module's unusual 'no head reshape, scale by
    head_dim**-0.5 on full-dim scores' semantics exactly.
    """
    B, N, D = x.shape
    assert D % head_num == 0
    head_dim = D // head_num
    scale = float(head_dim) ** (-0.5)

    # Pad the embedding dim to a lane-dense multiple of 128 (no-op for real
    # ViT dims 128/256/384/768/1024); padded rows/cols of W and b are zero so
    # results are unchanged — padded output columns are sliced off at the end.
    Dp = _round_up(D, 128)
    pad = Dp - D

    w = w_qkv.astype(jnp.float32)
    b = b_qkv.astype(jnp.float32).reshape(3 * D)
    # Fold the softmax scale into the Q projection (one-time constant fold).
    w_q, w_k, w_v = w[:, :D] * scale, w[:, D:2 * D], w[:, 2 * D:]
    b_q, b_k, b_v = b[:D] * scale, b[D:2 * D], b[2 * D:]

    pad_w = lambda m: jnp.pad(m, ((0, pad), (0, pad)))
    pad_b = lambda v: jnp.pad(v, (0, pad))
    w_qkv_p = jnp.concatenate([pad_w(w_q), pad_w(w_k), pad_w(w_v)],
                              axis=1).astype(jnp.bfloat16)          # (Dp, 3Dp) bf16
    b_qkv_p = jnp.concatenate([pad_b(b_q), pad_b(b_k), pad_b(b_v)]
                              ).reshape(1, 3 * Dp)                  # f32
    w_proj_p = pad_w(w_proj.astype(jnp.float32)).astype(jnp.bfloat16)
    b_proj_p = pad_b(b_proj.astype(jnp.float32).reshape(D)).reshape(1, Dp)

    # bf16 input: halves DMA bytes and the double-buffered VMEM footprint.
    x_p = x.astype(jnp.bfloat16)
    if pad:
        x_p = jnp.pad(x_p, ((0, 0), (0, 0), (0, pad)))

    out_dtype = x.dtype

    if block_q is None:
        block_q = _pick_block_q(N)
    assert N % block_q == 0
    grid_q = N // block_q

    if block_b is None:
        block_b = _pick_block_b(B, N, Dp, block_q, jnp.zeros((), out_dtype).dtype.itemsize)
    assert B % block_b == 0
    grid_b = B // block_b

    # Constant-index operands: single-buffer (no point double-buffering weights
    # that are never re-fetched — halves their VMEM footprint).
    const = dict(pipeline_mode=pl.Buffered(1))

    out = pl.pallas_call(
        _mha_kernel,
        out_shape=jax.ShapeDtypeStruct((B, N, Dp), out_dtype),
        grid_spec=pltpu.PrefetchScalarGridSpec(
            num_scalar_prefetch=0,
            grid=(grid_b, grid_q),
            in_specs=[
                pl.BlockSpec((block_b, N, Dp), lambda b, q: (b, 0, 0)),     # x tile
                pl.BlockSpec((Dp, 3 * Dp), lambda b, q: (0, 0), **const),   # W_qkv
                pl.BlockSpec((1, 3 * Dp), lambda b, q: (0, 0), **const),    # b_qkv
                pl.BlockSpec((Dp, Dp), lambda b, q: (0, 0), **const),       # W_proj
                pl.BlockSpec((1, Dp), lambda b, q: (0, 0), **const),        # b_proj
            ],
            out_specs=pl.BlockSpec((block_b, block_q, Dp),
                                   lambda b, q: (b, q, 0)),
            scratch_shapes=[
                pltpu.VMEM((block_b, N, Dp), jnp.bfloat16),   # K projection
                pltpu.VMEM((block_b, N, Dp), jnp.bfloat16),   # V projection
            ],
        ),
        compiler_params=pltpu.CompilerParams(
            # batch axis parallel (megacore sharding); query axis carries the
            # K/V scratch dependency, so it stays "arbitrary" (sequential).
            dimension_semantics=("parallel", "arbitrary"),
            # Leave headroom under v7x's 64 MiB physical VMEM; fine on v5e/v6e.
            vmem_limit_bytes=48 * 1024 * 1024,
        ),
    )(x_p, w_qkv_p, b_qkv_p, w_proj_p, b_proj_p)

    return out[..., :D] if pad else out


def _reference(x, w_qkv, b_qkv, w_proj, b_proj, head_num):
    # plain-JAX f32 reference mirroring the PyTorch forward
    D = x.shape[-1]
    head_dim = D // head_num
    scale = float(head_dim) ** (-0.5)
    qkv = x @ w_qkv + b_qkv[0]
    q, k, v = qkv[..., :D], qkv[..., D:2 * D], qkv[..., 2 * D:]
    attn = jnp.einsum("bnd,bmd->bnm", q, k) * scale
    attn = jax.nn.softmax(attn, axis=-1)
    out = jnp.einsum("bnm,bmd->bnd", attn, v)
    return out @ w_proj + b_proj[0]


if __name__ == "__main__":
    # small shapes consistent with the module: batch=2, patches=8, dim=32, heads=4
    B, N, D, H = 2, 8, 32, 4
    drop_prob = 0.0  # dropout is identity

    key = jax.random.PRNGKey(0)
    kx, k1, k2, k3, k4 = jax.random.split(key, 5)

    x = jax.random.normal(kx, (B, N, D), dtype=jnp.float32)
    # deterministic parameter init (synthetic; not loading a checkpoint)
    w_qkv = jax.random.normal(k1, (D, 3 * D), dtype=jnp.float32) * 0.05
    b_qkv = jax.random.normal(k2, (1, 3 * D), dtype=jnp.float32) * 0.01
    w_proj = jax.random.normal(k3, (D, D), dtype=jnp.float32) * 0.05
    b_proj = jax.random.normal(k4, (1, D), dtype=jnp.float32) * 0.01

    out = multi_head_forward(x, w_qkv, b_qkv, w_proj, b_proj, head_num=H)
    out = jax.block_until_ready(out)

    ref = _reference(x, w_qkv, b_qkv, w_proj, b_proj, H)
    assert out.shape == (B, N, D)
    # bf16 MXU operands dominate the error; exact softmax reciprocal lets us
    # tighten the tolerance vs. the previous approx-reciprocal version.
    err = float(jnp.max(jnp.abs(out - ref)))
    assert jnp.allclose(out, ref, atol=2e-2, rtol=2e-2), err

    print("KERNEL_OK")
</pallas_src>

<mosaic_0001>
module attributes {stable_mosaic.version = 11 : i64} {
  func.func @_mha_kernel(%arg0: i32, %arg1: i32, %arg2: memref<1x8x128xbf16, #tpu.memory_space<vmem>>, %arg3: memref<128x384xbf16, #tpu.memory_space<vmem>>, %arg4: memref<1x384xf32, #tpu.memory_space<vmem>>, %arg5: memref<128x128xbf16, #tpu.memory_space<vmem>>, %arg6: memref<1x128xf32, #tpu.memory_space<vmem>>, %arg7: memref<1x8x128xf32, #tpu.memory_space<vmem>>, %arg8: memref<1x8x128xbf16, #tpu.memory_space<vmem>>, %arg9: memref<1x8x128xbf16, #tpu.memory_space<vmem>>) attributes {dimension_semantics = [#tpu.dimension_semantics<parallel>, #tpu.dimension_semantics<arbitrary>], iteration_bounds = array<i64: 2, 1>, scalar_prefetch = 0 : i64, scratch_operands = 2 : i64, tpu.core_type = #tpu.core_type<tc>, window_params = [{transform_indices = @transform_0, window_bounds = array<i64: 1, 8, 128>}, {pipeline_mode = #tpu.pipeline_mode<synchronous>, transform_indices = @transform_1, window_bounds = array<i64: 128, 384>}, {pipeline_mode = #tpu.pipeline_mode<synchronous>, transform_indices = @transform_2, window_bounds = array<i64: 1, 384>}, {pipeline_mode = #tpu.pipeline_mode<synchronous>, transform_indices = @transform_3, window_bounds = array<i64: 128, 128>}, {pipeline_mode = #tpu.pipeline_mode<synchronous>, transform_indices = @transform_4, window_bounds = array<i64: 1, 128>}, {transform_indices = @transform_5, window_bounds = array<i64: 1, 8, 128>}]} {
    %c0_i32 = arith.constant 0 : i32
    %0 = arith.cmpi eq, %arg1, %c0_i32 : i32
    %1 = arith.extui %0 : i1 to i32
    %c0_i32_0 = arith.constant 0 : i32
    %2 = arith.cmpi ne, %1, %c0_i32_0 : i32
    scf.if %2 {
      %c0_24 = arith.constant 0 : index
      %c0_25 = arith.constant 0 : index
      %c0_26 = arith.constant 0 : index
      %37 = vector.load %arg2[%c0_24, %c0_25, %c0_26] : memref<1x8x128xbf16, #tpu.memory_space<vmem>>, vector<1x8x128xbf16>
      %c0_27 = arith.constant 0 : index
      %c128 = arith.constant 128 : index
      %38 = vector.load %arg3[%c0_27, %c128] : memref<128x384xbf16, #tpu.memory_space<vmem>>, vector<128x256xbf16>
      %cst_28 = arith.constant dense<0.000000e+00> : vector<1x8x256xf32>
      %39 = tpu.matmul %37, %38, %cst_28 {dimension_numbers = #tpu.dot_dimension_numbers<[2], [0], [0, 1], [1], [0, 0, 0, 1, 1, 1], [], []>} : vector<1x8x128xbf16>, vector<128x256xbf16>, vector<1x8x256xf32> -> vector<1x8x256xf32>
      %c0_29 = arith.constant 0 : index
      %c128_30 = arith.constant 128 : index
      %40 = vector.load %arg4[%c0_29, %c128_30] : memref<1x384xf32, #tpu.memory_space<vmem>>, vector<1x256xf32>
      %41 = vector.shape_cast %40 : vector<1x256xf32> to vector<1x1x256xf32>
      %42 = vector.broadcast %41 : vector<1x1x256xf32> to vector<1x8x256xf32>
      %43 = arith.addf %39, %42 : vector<1x8x256xf32>
      %44 = arith.truncf %43 : vector<1x8x256xf32> to vector<1x8x256xbf16>
      %45 = vector.extract_strided_slice %44 {offsets = [0, 0, 0], sizes = [1, 8, 128], strides = [1, 1, 1]} : vector<1x8x256xbf16> to vector<1x8x128xbf16>
      %c0_31 = arith.constant 0 : index
      %c0_32 = arith.constant 0 : index
      %c0_33 = arith.constant 0 : index
      %46 = vector.load %arg8[%c0_31, %c0_32, %c0_33] : memref<1x8x128xbf16, #tpu.memory_space<vmem>>, vector<1x8x128xbf16>
      tpu.vector_store %arg8[%c0_31, %c0_32, %c0_33], %45 {strides = array<i32>} : memref<1x8x128xbf16, #tpu.memory_space<vmem>>, vector<1x8x128xbf16>,
      %47 = vector.extract_strided_slice %44 {offsets = [0, 0, 128], sizes = [1, 8, 128], strides = [1, 1, 1]} : vector<1x8x256xbf16> to vector<1x8x128xbf16>
      %c0_34 = arith.constant 0 : index
      %c0_35 = arith.constant 0 : index
      %c0_36 = arith.constant 0 : index
      %48 = vector.load %arg9[%c0_34, %c0_35, %c0_36] : memref<1x8x128xbf16, #tpu.memory_space<vmem>>, vector<1x8x128xbf16>
      tpu.vector_store %arg9[%c0_34, %c0_35, %c0_36], %47 {strides = array<i32>} : memref<1x8x128xbf16, #tpu.memory_space<vmem>>, vector<1x8x128xbf16>,
    } else {
    }
    %c8_i32 = arith.constant 8 : i32
    %3 = arith.muli %arg1, %c8_i32 : i32
    %4 = tpu.assume_multiple %3, 8 : i32
    %c0 = arith.constant 0 : index
    %5 = arith.index_cast %4 : i32 to index
    %c0_1 = arith.constant 0 : index
    %6 = vector.load %arg2[%c0, %5, %c0_1] : memref<1x8x128xbf16, #tpu.memory_space<vmem>>, vector<1x8x128xbf16>
    %c0_2 = arith.constant 0 : index
    %c0_3 = arith.constant 0 : index
    %7 = vector.load %arg3[%c0_2, %c0_3] : memref<128x384xbf16, #tpu.memory_space<vmem>>, vector<128x128xbf16>
    %cst = arith.constant dense<0.000000e+00> : vector<1x8x128xf32>
    %8 = tpu.matmul %6, %7, %cst {dimension_numbers = #tpu.dot_dimension_numbers<[2], [0], [0, 1], [1], [0, 0, 0, 1, 1, 1], [], []>} : vector<1x8x128xbf16>, vector<128x128xbf16>, vector<1x8x128xf32> -> vector<1x8x128xf32>
    %c0_4 = arith.constant 0 : index
    %c0_5 = arith.constant 0 : index
    %9 = vector.load %arg4[%c0_4, %c0_5] : memref<1x384xf32, #tpu.memory_space<vmem>>, vector<1x128xf32>
    %10 = vector.shape_cast %9 : vector<1x128xf32> to vector<1x1x128xf32>
    %11 = vector.broadcast %10 : vector<1x1x128xf32> to vector<1x8x128xf32>
    %12 = arith.addf %8, %11 : vector<1x8x128xf32>
    %13 = arith.truncf %12 : vector<1x8x128xf32> to vector<1x8x128xbf16>
    %c0_6 = arith.constant 0 : index
    %c0_7 = arith.constant 0 : index
    %c0_8 = arith.constant 0 : index
    %14 = vector.load %arg8[%c0_6, %c0_7, %c0_8] : memref<1x8x128xbf16, #tpu.memory_space<vmem>>, vector<1x8x128xbf16>
    "tpu.trace_start"() <{level = 10 : i32, message = "bqd,bkd->bqk"}> : () -> ()
    %cst_9 = arith.constant dense<0.000000e+00> : vector<1x8x8xf32>
    %15 = tpu.matmul %13, %14, %cst_9 {dimension_numbers = #tpu.dot_dimension_numbers<[2], [2], [1], [1], [0, 0, 0, 1, 1, 1], [0], [0]>} : vector<1x8x128xbf16>, vector<1x8x128xbf16>, vector<1x8x8xf32> -> vector<1x8x8xf32>
    "tpu.trace_stop"() : () -> ()
    %cst_10 = arith.constant dense<0xFF800000> : vector<1x8xf32>
    %16 = vector.multi_reduction <maximumf>, %15, %cst_10 [2] : vector<1x8x8xf32> to vector<1x8xf32>
    %17 = vector.shape_cast %16 : vector<1x8xf32> to vector<1x8x1xf32>
    %18 = vector.broadcast %17 : vector<1x8x1xf32> to vector<1x8x8xf32>
    %19 = arith.subf %15, %18 : vector<1x8x8xf32>
    %20 = math.exp %19 : vector<1x8x8xf32>
    %cst_11 = arith.constant dense<0.000000e+00> : vector<1x8xf32>
    %21 = vector.multi_reduction <add>, %20, %cst_11 [2] : vector<1x8x8xf32> to vector<1x8xf32>
    %22 = vector.shape_cast %21 : vector<1x8xf32> to vector<1x8x1xf32>
    %23 = tpu.reciprocal %22 : vector<1x8x1xf32> -> vector<1x8x1xf32>
    %24 = vector.broadcast %23 : vector<1x8x1xf32> to vector<1x8x8xf32>
    %25 = arith.mulf %20, %24 : vector<1x8x8xf32>
    %26 = arith.truncf %25 : vector<1x8x8xf32> to vector<1x8x8xbf16>
    %c0_12 = arith.constant 0 : index
    %c0_13 = arith.constant 0 : index
    %c0_14 = arith.constant 0 : index
    %27 = vector.load %arg9[%c0_12, %c0_13, %c0_14] : memref<1x8x128xbf16, #tpu.memory_space<vmem>>, vector<1x8x128xbf16>
    "tpu.trace_start"() <{level = 10 : i32, message = "bqk,bkd->bqd"}> : () -> ()
    %cst_15 = arith.constant dense<0.000000e+00> : vector<1x8x128xf32>
    %28 = tpu.matmul %26, %27, %cst_15 {dimension_numbers = #tpu.dot_dimension_numbers<[2], [1], [1], [2], [0, 0, 0, 1, 1, 2], [0], [0]>} : vector<1x8x8xbf16>, vector<1x8x128xbf16>, vector<1x8x128xf32> -> vector<1x8x128xf32>
    "tpu.trace_stop"() : () -> ()
    %29 = arith.truncf %28 : vector<1x8x128xf32> to vector<1x8x128xbf16>
    %c0_16 = arith.constant 0 : index
    %c0_17 = arith.constant 0 : index
    %30 = vector.load %arg5[%c0_16, %c0_17] : memref<128x128xbf16, #tpu.memory_space<vmem>>, vector<128x128xbf16>
    %cst_18 = arith.constant dense<0.000000e+00> : vector<1x8x128xf32>
    %31 = tpu.matmul %29, %30, %cst_18 {dimension_numbers = #tpu.dot_dimension_numbers<[2], [0], [0, 1], [1], [0, 0, 0, 1, 1, 1], [], []>} : vector<1x8x128xbf16>, vector<128x128xbf16>, vector<1x8x128xf32> -> vector<1x8x128xf32>
    %c0_19 = arith.constant 0 : index
    %c0_20 = arith.constant 0 : index
    %32 = vector.load %arg6[%c0_19, %c0_20] : memref<1x128xf32, #tpu.memory_space<vmem>>, vector<1x128xf32>
    %33 = vector.shape_cast %32 : vector<1x128xf32> to vector<1x1x128xf32>
    %34 = vector.broadcast %33 : vector<1x1x128xf32> to vector<1x8x128xf32>
    %35 = arith.addf %31, %34 : vector<1x8x128xf32>
    %c0_21 = arith.constant 0 : index
    %c0_22 = arith.constant 0 : index
    %c0_23 = arith.constant 0 : index
    %36 = vector.load %arg7[%c0_21, %c0_22, %c0_23] : memref<1x8x128xf32, #tpu.memory_space<vmem>>, vector<1x8x128xf32>
    tpu.vector_store %arg7[%c0_21, %c0_22, %c0_23], %35 {strides = array<i32>} : memref<1x8x128xf32, #tpu.memory_space<vmem>>, vector<1x8x128xf32>,
    return
  }
  func.func @transform_0(%arg0: i32, %arg1: i32) -> (i32, i32, i32) {
    %c0_i32 = arith.constant 0 : i32
    %c0_i32_0 = arith.constant 0 : i32
    %c0_i32_1 = arith.constant 0 : i32
    return %arg0, %c0_i32, %c0_i32_0 : i32, i32, i32
  }
  func.func @transform_1(%arg0: i32, %arg1: i32) -> (i32, i32) {
    %c0_i32 = arith.constant 0 : i32
    %c0_i32_0 = arith.constant 0 : i32
    %c0_i32_1 = arith.constant 0 : i32
    return %c0_i32, %c0_i32_0 : i32, i32
  }
  func.func @transform_2(%arg0: i32, %arg1: i32) -> (i32, i32) {
    %c0_i32 = arith.constant 0 : i32
    %c0_i32_0 = arith.constant 0 : i32
    %c0_i32_1 = arith.constant 0 : i32
    return %c0_i32, %c0_i32_0 : i32, i32
  }
  func.func @transform_3(%arg0: i32, %arg1: i32) -> (i32, i32) {
    %c0_i32 = arith.constant 0 : i32
    %c0_i32_0 = arith.constant 0 : i32
    %c0_i32_1 = arith.constant 0 : i32
    return %c0_i32, %c0_i32_0 : i32, i32
  }
  func.func @transform_4(%arg0: i32, %arg1: i32) -> (i32, i32) {
    %c0_i32 = arith.constant 0 : i32
    %c0_i32_0 = arith.constant 0 : i32
    %c0_i32_1 = arith.constant 0 : i32
    return %c0_i32, %c0_i32_0 : i32, i32
  }
  func.func @transform_5(%arg0: i32, %arg1: i32) -> (i32, i32, i32) {
    %c0_i32 = arith.constant 0 : i32
    %c0_i32_0 = arith.constant 0 : i32
    return %arg0, %arg1, %c0_i32 : i32, i32, i32
  }
}

</mosaic_0001>

<bundles_post_ra>
// kernel: tpu_custom_call.1
= control target key start
LH: loop header
LB: loop body
LE: loop exit
PB: predicated region body
PF: predicated region fallthrough
CT: control target
= control target key end

     0   :  { %10 = vsyncpa [#allocation5], 0  ;;  %s1658_s0 = inlined_call_operand.hbm [shape: bf16[2,8,128], index: 0, kind: input, shape index: {}]   ;;  %s1659_s1 = inlined_call_operand.hbm [shape: bf16[128,384], index: 1, kind: input, shape index: {}]   ;;  %s1660_s2 = inlined_call_operand.vmem [shape: f32[1,384], index: 2, kind: input, shape index: {}]   ;;  %s1661_s3 = inlined_call_operand.hbm [shape: bf16[128,128], index: 3, kind: input, shape index: {}]   ;;  %s1662_s4 = inlined_call_operand.vmem [shape: f32[1,128], index: 4, kind: input, shape index: {}]   ;;  %s1663_s5 = inlined_call_operand.hbm [shape: f32[2,8,128], index: 5, kind: output, shape index: {}]  }
   0x1   :  { %12 = vsyncpa [#allocation5 + $0x1], 0 }
   0x2   :  { %13 = vsyncpa [#allocation8], 0 }
   0x3   :  { %14 = vsyncpa [#allocation6], 0 }
   0x4   :  { %16 = vsyncpa [#allocation6 + $0x1], 0  ;;  %s1365_s18 = smov 0   ;;  %s1367_s19 = smov 0  }
   0x5   :  { %s1369_s20 = smov 0   ;;  %s1371_s21 = smov 0  }
   0x6   :  { %s1373_s22 = smov 0   ;;  %s1375_s23 = smov 0  }
   0x7 LB: > { %s890_s24 = sadd.s32 4294967295, %s1322_s23   ;;  %s891_s25 = sadd.s32 4294967294, %s1322_s23   ;;  %s1322_s23 = sphi %s1375_s23, %s22_s23   ;;  %s1318_s22 = sphi %s1373_s22, %s1685_s22   ;;  %s1314_s21 = sphi %s1371_s21, %s1684_s21   ;;  %s1310_s20 = sphi %s1369_s20, %s1683_s20   ;;  %s1306_s19 = sphi %s1367_s19, %s1682_s19   ;;  %s1302_s18 = sphi %s1365_s18, %s1681_s18  }
   0x8   : > { %p54_p0 = scmp.ne.s32.totalorder %s1306_s19, %s1302_s18  ;;  %p1399_p1 = scmp.eq.s32.totalorder %s890_s24, 0 }
   0x9   : > { %p1403_p2 = scmp.eq.s32.totalorder %s890_s24, 1  ;;  %p170_p3 = scmp.eq.s32.totalorder %s891_s25, 1 }
   0xa   : > { %s1668_s26 = scalar_select %p1399_p1, 1, 0 }
   0xb   : > { %p1409_p4 = por %p1399_p1, %p54_p0  ;;  %p892_p5 = scmp.ge.s32.totalorder %s1322_s23, 1 }
   0xc   : > { %p1414_p6 = por %p170_p3, %p54_p0  ;;  %p177_p7 = scmp.lt.s32.totalorder %s1322_s23, 3 }
   0xd   : > { %s1670_s28 = scalar_select %p1409_p4, 1, 0 }
   0xe   : > { %s1671_s29 = scalar_select %p1414_p6, 1, 0 }
   0xf   : > { %p1419_p8 = pnand %p892_p5, %p177_p7  ;;  %s1324_s6 = smov [#allocation7]  }
  0x10   : > { %s189_s7 = sshll.u32 %s1324_s6, 4  ;;  %s1325_s9 = smov [#allocation9]   ;;  %s1423_s7 = int_to_ptr.vmem [resolvable:$true] %s189_s7 }
  0x11   : > { %p1028_p9 = pneg %p1419_p8  ;;  %s205_s10 = sshll.u32 %s1325_s9, 4  ;;  %s1434_s10 = int_to_ptr.vmem [resolvable:$true] %s205_s10 }
  0x12   : > { %s1150_s13 = scalar_lea.hbm %s1659_s1, 3072 }
  0x13   : > { %p1430_p11 = pnand %p1028_p9, %p1399_p1  ;;  %p1151_p12 = scmp.ne.s32.totalorder %s1659_s1, %s1150_s13 }
  0x14   : > { %p1157_p5 = scmp.lt.u32.totalorder %s1150_s13, %s1659_s1 }
  0x15   : > { %p1152_p13 = pneg %p1430_p11 }
  0x17   : > { %p1153_p0 = pnand %p1152_p13, %p1151_p12 }
  0x19   : > { %p1154_p3 = pneg %p1153_p0 }
  0x1b   : > { %p1159_p7 = pnand %p1157_p5, %p1154_p3 }
  0x1d   : > { %1162 = shalt.err (!%p1159_p7)
}
  0x1e   : > { %s1163_s24 = scalar_lea.vmem %s1423_s7, 3072  ;;  %p1171_p1 = scmp.lt.s32.totalorder %s1423_s7, %s1423_s7 }
  0x1f   : > { %p1164_p9 = scmp.ne.s32.totalorder %s1423_s7, %s1163_s24  ;;  %p1172_p12 = scmp.lt.s32.totalorder %s1163_s24, %s1163_s24 }
  0x21   : > { %p1166_p10 = pnand %p1164_p9, %p1152_p13  ;;  %p1173_p0 = por %p1172_p12, %p1171_p1 }
  0x23   : > { %p1167_p6 = pneg %p1166_p10 }
  0x25   : > { %p1174_p4 = pnand %p1173_p0, %p1167_p6 }
  0x27   : > { %1177 = shalt.err (!%p1174_p4)
}
  0x28   : > { %s1326_s25 = smov 192   ;;  %s1327_s6 = smov 12  }
  0x29   : > { %1031 = dma.hbm_to_vmem [thread:$0]  (!%p1430_p11), %s1659_s1, 3072, %s1423_s7, [#allocation8], %s1326_s25, %s1326_s25, %s1327_s6  }
  0x2a   : > { %s1178_s14 = scalar_lea.hbm %s1661_s3, 1024 }
  0x2b   : > { %p1179_p1 = scmp.ne.s32.totalorder %s1661_s3, %s1178_s14  ;;  %p1185_p10 = scmp.lt.u32.totalorder %s1178_s14, %s1661_s3 }
  0x2d   : > { %p1181_p4 = pnand %p1179_p1, %p1152_p13 }
  0x2f   : > { %p1182_p6 = pneg %p1181_p4 }
  0x31   : > { %p1187_p3 = pnand %p1185_p10, %p1182_p6 }
  0x33   : > { %1190 = shalt.err (!%p1187_p3)
}
  0x34   : > { %s1191_s7 = scalar_lea.vmem %s1434_s10, 1024  ;;  %p1199_p12 = scmp.lt.s32.totalorder %s1434_s10, %s1434_s10 }
  0x35   : > { %p1192_p5 = scmp.ne.s32.totalorder %s1434_s10, %s1191_s7  ;;  %p1200_p0 = scmp.lt.s32.totalorder %s1191_s7, %s1191_s7 }
  0x37   : > { %p1194_p7 = pnand %p1192_p5, %p1152_p13  ;;  %p1201_p1 = por %p1200_p0, %p1199_p12 }
  0x39   : > { %p1195_p9 = pneg %p1194_p7 }
  0x3b   : > { %p1202_p4 = pnand %p1201_p1, %p1195_p9 }
  0x3d   : > { %1205 = shalt.err (!%p1202_p4)
}
  0x3e   : > { %s1328_s25 = smov 64   ;;  %s1329_s6 = smov 4  }
  0x3f   : > { %1034 = dma.hbm_to_vmem [thread:$0]  (!%p1430_p11), %s1661_s3, 1024, %s1434_s10, [#allocation8], %s1328_s25, %s1328_s25, %s1329_s6  }
  0x40   : > { %s34_s12 = sadd.s32 1, %s1318_s22  ;;  %s41_s13 = sadd.s32 1, %s1310_s20 }
  0x41   : > { %p36_p13 = scmp.ge.s32.totalorder %s34_s12, 2  ;;  %p48_p6 = scmp.ne.s32.totalorder %s1310_s20, %s1306_s19 }
  0x42   : > { %p49_p10 = scmp.eq.s32.totalorder %s1322_s23, 0  ;;  %p1045_p3 = scmp.lt.s32.totalorder %s1322_s23, 2 }
  0x43   : > { %s1687_s12 = smov (%p36_p13, %s34_s12), 0  ;;  %p1498_p7 = por %p1403_p2, %p48_p6 }
  0x44   : > { %p50_p5 = por %p49_p10, %p48_p6  ;;  %s38_s8 = ssub.s32 %s1318_s22, %s1687_s12 }
  0x45   : > { %s1674_s14 = scalar_select %p1498_p7, 1, 0 }
  0x46   : > { %s222_s15 = sand.u32 1, %s1310_s20   ;;  %p39_p9 = scmp.eq.s32.totalorder %s38_s8, 0 }
  0x47   : > { %s896_s10 = sshll.u32 %s222_s15, 2  ;;  %s897_s16 = sshll.u32 %s1318_s22, 6 }
  0x48   : > { %s1507_s17 = scalar_select %p39_p9, %s1310_s20, %s41_s13  }
  0x49   : > { %s1512_s25 = scalar_lea.hbm %s1658_s0, %s897_s16  ;;  %s226_s27 = scalar_lea.vmem [#allocation4], %s896_s10 }
  0x4a   : > { %s233_s6 = sshll.u32 %s226_s27, 4  ;;  %p1516_p2 = pnand %p1045_p3, %p50_p5  ;;  %s1520_s6 = int_to_ptr.vmem [resolvable:$true] %s233_s6 }
  0x4b   : > { %s223_s11 = scalar_lea.sflag [#allocation5], %s222_s15  ;;  %s1206_s13 = scalar_lea.hbm %s1512_s25, 64 }
  0x4c   : > { %p1207_p11 = scmp.ne.s32.totalorder %s1512_s25, %s1206_s13  ;;  %p1208_p12 = pneg %p1516_p2 }
  0x4d   : > { %s1211_s16 = scalar_lea.hbm %s1658_s0, 128  ;;  %p1212_p4 = scmp.lt.u32.totalorder %s1512_s25, %s1658_s0 }
  0x4e   : > { %p1209_p0 = pnand %p1208_p12, %p1207_p11  ;;  %p1213_p13 = scmp.lt.u32.totalorder %s1211_s16, %s1206_s13 }
  0x4f   : > { %p1215_p10 = scmp.lt.u32.totalorder %s1206_s13, %s1512_s25 }
  0x50   : > { %p1210_p1 = pneg %p1209_p0  ;;  %p1214_p6 = por %p1213_p13, %p1212_p4 }
  0x52   : > { %p1216_p3 = por %p1215_p10, %p1214_p6 }
  0x54   : > { %p1217_p5 = pnand %p1216_p3, %p1210_p1 }
  0x56   : > { %1220 = shalt.err (!%p1217_p5)
}
  0x57   : > { %s1221_s15 = scalar_lea.vmem %s1520_s6, 64  ;;  %s1330_s27 = smov [#allocation4]  }
  0x58   : > { %p1222_p9 = scmp.ne.s32.totalorder %s1520_s6, %s1221_s15  ;;  %s1226_s8 = sshll.u32 %s1330_s27, 4  ;;  %s1227_s8 = int_to_ptr.vmem [resolvable:$false] %s1226_s8 }
  0x59   : > { %s1228_s10 = scalar_lea.vmem %s1227_s8, 128  ;;  %p1229_p7 = scmp.lt.s32.totalorder %s1520_s6, %s1227_s8 }
  0x5a   : > { %p1224_p11 = pnand %p1222_p9, %p1208_p12  ;;  %p1230_p4 = scmp.lt.s32.totalorder %s1228_s10, %s1221_s15 }
  0x5c   : > { %p1225_p0 = pneg %p1224_p11  ;;  %p1231_p13 = por %p1230_p4, %p1229_p7 }
  0x5e   : > { %p1232_p6 = pnand %p1231_p13, %p1225_p0 }
  0x60   : > { %1235 = shalt.err (!%p1232_p6)
}
  0x61   : > { %1038 = dma.hbm_to_vmem [thread:$0]  (!%p1516_p2), %s1512_s25, 64, %s1520_s6, %s223_s11  }
  0x62   : > { %242 = sbr.rel (%p1419_p8) target bundleno = 1344 (0x540), region = 40  ;;  %s1550_s13 = sand.u32 (!%p1419_p8), 1, %s1306_s19  }
  0x63   : > { %s899_s16 = sshll.u32 (!%p1419_p8), %s1550_s13, 2  ;;  %s245_s24 = scalar_lea.sflag (!%p1419_p8), [#allocation5], %s1550_s13 }
  0x64   : > { %s1554_s7 = scalar_lea.vmem (!%p1419_p8), [#allocation4], %s899_s16  ;;  %p1676_p7 = scmp.ne.s32.totalorder (!%p1419_p8), %s1670_s28, 0 }
  0x69   : > { %1289 = dma.done.wait (%p1676_p7), %s245_s24, 64  }
  0x6a   : > { %1291 = vsyncadd (%p1676_p7), %s245_s24, 4294967232  ;;  %p1677_p2 = scmp.ne.s32.totalorder %s1668_s26, 0 }
  0x6c   : > { %1293 = dma.done.wait (%p1677_p2), [#allocation8], 4096  }
  0x6d   : > { %1295 = vsyncadd (%p1677_p2), [#allocation8], 4294963200  ;;  %v1331_v0 = vmov 0.0   ;;  %v1332_v1 = vmov 0   ;;  %vm1333_vm0 = vmmov 0   ;;  %v307_v28 = vlaneseq  ;;  %v1138_v63 = vld [vmem:[#allocation9] sm:$0xff]  }
  0x6e   : > { %964 = vmatprep.subr.bf16.mxu1 %v1331_v0  ;;  %429 = vmatprep.mubr.bf16.mxu0 %v1332_v1  ;;  %v1106_v2 = vld [vmem:[#allocation7 + $0x8] ss:$12 sps:$4 sm:$0xff]   ;;  %v1108_v3 = vld [vmem:[#allocation7 + $0x4] ss:$12 sps:$4 sm:$0xff]   ;;  %v1109_v4 = vld [vmem:[#allocation7 + $0x20] ss:$12 sps:$4 sm:$0xff]  }
  0x6f   : > { %980 = vmatprep.mubr.msk.bf16.mxu1 %vm1333_vm0, %v1331_v0  ;;  %397 = vmatprep.subr.bf16.mxu0 %v1106_v2  ;;  %v1111_v5 = vld [vmem:[#allocation7 + $0x1c] ss:$12 sps:$4 sm:$0xff]   ;;  %v1112_v6 = vld [vmem:[#allocation7 + $0x38] ss:$12 sps:$4 sm:$0xff]   ;;  %v1118_v7 = vld [vmem:[#allocation7] ss:$12 sps:$4 sm:$0xff]  }
  0x70   : > { %398 = vmatpush1.bf16.msra.mxu0 %v1108_v3  ;;  %v1114_v8 = vld [vmem:[#allocation7 + $0x34] ss:$12 sps:$4 sm:$0xff]   ;;  %v1115_v9 = vld [vmem:[#allocation7 + $0x50] ss:$12 sps:$4 sm:$0xff]   ;;  %965 = vmatpush3.bf16.msra.mxu1 %v1118_v7  ;;  %v1122_v10 = vld [vmem:[#allocation7 + $0x18] ss:$12 sps:$4 sm:$0xff]  }
  0x71   : > { %399 = vmatprep.subr.bf16.mxu0 %v1109_v4  ;;  %966 = vmatprep.subr.bf16.mxu1 %v1331_v0  ;;  %v1117_v11 = vld [vmem:[#allocation7 + $0x4c] ss:$12 sps:$4 sm:$0xff]   ;;  %v1119_v12 = vld [vmem:[#allocation7 + $0x68] ss:$12 sps:$4 sm:$0xff]   ;;  %v1126_v13 = vld [vmem:[#allocation7 + $0x30] ss:$12 sps:$4 sm:$0xff]  }
  0x72   : > { %v1121_v14 = vld [vmem:[#allocation7 + $0x64] ss:$12 sps:$4 sm:$0xff]   ;;  %v1123_v15 = vld [vmem:[#allocation7 + $0x80] ss:$12 sps:$4 sm:$0xff]   ;;  %v1130_v16 = vld [vmem:[#allocation7 + $0x48] ss:$12 sps:$4 sm:$0xff]  }
  0x73   : > { %v1125_v17 = vld [vmem:[#allocation7 + $0x7c] ss:$12 sps:$4 sm:$0xff]   ;;  %v1127_v18 = vld [vmem:[#allocation7 + $0x98] ss:$12 sps:$4 sm:$0xff]   ;;  %v1134_v19 = vld [vmem:[#allocation7 + $0x60] ss:$12 sps:$4 sm:$0xff]  }
  0x74   : > { %400 = vmatpush1.bf16.msra.mxu0 %v1111_v5  ;;  %967 = vmatpush3.bf16.msra.mxu1 %v1122_v10  ;;  %v1129_v20 = vld [vmem:[#allocation7 + $0x94] ss:$12 sps:$4 sm:$0xff]   ;;  %v1131_v21 = vld [vmem:[#allocation7 + $0xb0] ss:$12 sps:$4 sm:$0xff]   ;;  %v1135_v22 = vld [vmem:[#allocation7 + $0x78] ss:$12 sps:$4 sm:$0xff]  }
  0x75   : > { %401 = vmatprep.subr.bf16.mxu0 %v1112_v6  ;;  %968 = vmatprep.subr.bf16.mxu1 %v1331_v0  ;;  %v1133_v23 = vld [vmem:[#allocation7 + $0xac] ss:$12 sps:$4 sm:$0xff]   ;;  %v1136_v24 = vld [vmem:[#allocation7 + $0x90] ss:$12 sps:$4 sm:$0xff]   ;;  %v1137_v26 = vld [vmem:[#allocation7 + $0xa8] ss:$12 sps:$4 sm:$0xff]  }
  0x76   : > { %v288_v25 = vld [vmem:[%s1554_s7] sm:$0xf]  ;;  %v308_v29 = vshrl.u32 %v307_v28, 7  ;;  %v305_v31 = vld [vmem:[%s1660_s2 + $0x1] sm:$0x3]  ;;  %vm618_vm1 = vcmask 1043456  }
  0x77   : > { %v447_v27 = vld [vmem:[%s1554_s7] sm:$0xf]  ;;  %v919_v47 = vld [vmem:[%s1660_s2] ss:$0 sm:$0xff]  ;;  %vm601_vm2 = vcmask 64512   ;;  %v1139_v1 = vld [vmem:[#allocation9 + $0x8] sm:$0xff]  }
  0x78   : > { %402 = vmatpush1.bf16.msra.mxu0 %v1114_v8  ;;  %969 = vmatpush3.bf16.msra.mxu1 %v1126_v13  ;;  %v309_v30 = vsub.s32 0, %v308_v29  ;;  %v313_v32 = vsub.s32 1, %v308_v29  ;;  %v1140_v2 = vld [vmem:[#allocation9 + $0x10] sm:$0xff]   ;;  %v1141_v3 = vld [vmem:[#allocation9 + $0x18] sm:$0xff]   ;;  %v1142_v4 = vld [vmem:[#allocation9 + $0x20] sm:$0xff]   ;;  %s902_s6 = sshll.u32 %s1550_s13, 3 }
  0x79   : > { %403 = vmatprep.subr.bf16.mxu0 %v1115_v9  ;;  %970 = vmatprep.subr.bf16.mxu1 %v1331_v0  ;;  %v1143_v5 = vld [vmem:[#allocation9 + $0x28] sm:$0xff]   ;;  %v1144_v6 = vld [vmem:[#allocation9 + $0x30] sm:$0xff]   ;;  %s939_s15 = sshll.u32 %s1314_s21, 7  ;;  %s282_s27 = scalar_lea.vmem [#allocation10], %s902_s6 }
  0x7a   : > { %v310_v33 = vrot.slane %v305_v31, %v309_v30  ;;  %v314_v34 = vrot.slane %v305_v31, %v313_v32  ;;  %s790_s8 = sshll.u32 %s282_s27, 4  ;;  %s1609_s24 = scalar_lea.hbm %s1663_s5, %s939_s15  ;;  %s1611_s8 = int_to_ptr.vmem [resolvable:$true] %s790_s8 }
  0x7b   : > { %s776_s7 = scalar_lea.sflag [#allocation6], %s1550_s13  ;;  %s1236_s21 = scalar_lea.vmem %s1611_s8, 128 }
  0x7c   : > { %404 = vmatpush1.bf16.msra.mxu0 %v1117_v11  ;;  %971 = vmatpush3.bf16.msra.mxu1 %v1130_v16  ;;  %v1145_v11 = vld [vmem:[#allocation9 + $0x38] sm:$0xff]   ;;  %p1237_p8 = scmp.ne.s32.totalorder %s1611_s8, %s1236_s21  ;;  %p1678_p12 = scmp.ne.s32.totalorder %s1674_s14, 0 }
  0x7d   : > { %405 = vmatprep.subr.bf16.mxu0 %v1119_v12  ;;  %972 = vmatprep.subr.bf16.mxu1 %v1331_v0  ;;  %s1334_s26 = smov [#allocation10]  }
  0x7e   : > { %p1238_p1 = pnand %p1237_p8, %p1678_p12  ;;  %s1240_s28 = sshll.u32 %s1334_s26, 4  ;;  %s1241_s28 = int_to_ptr.vmem [resolvable:$false] %s1240_s28 }
  0x7f   : > { %s1242_s30 = scalar_lea.vmem %s1241_s28, 256  ;;  %p1243_p3 = scmp.lt.s32.totalorder %s1611_s8, %s1241_s28 }
  0x80   : > { %406 = vmatpush1.bf16.msra.mxu0 %v1121_v14  ;;  %973 = vmatpush3.bf16.msra.mxu1 %v1134_v19  ;;  %p1239_p10 = pneg %p1238_p1  ;;  %p1244_p5 = scmp.lt.s32.totalorder %s1242_s30, %s1236_s21 }
  0x81   : > { %407 = vmatprep.subr.bf16.mxu0 %v1123_v15  ;;  %974 = vmatprep.subr.bf16.mxu1 %v1331_v0 }
  0x82   : > { %p1245_p9 = por %p1244_p5, %p1243_p3 }
  0x84   : > { %408 = vmatpush1.bf16.msra.mxu0 %v1125_v17  ;;  %975 = vmatpush3.bf16.msra.mxu1 %v1135_v22  ;;  %p1246_p11 = pnand %p1245_p9, %p1239_p10 }
  0x85   : > { %409 = vmatprep.subr.bf16.mxu0 %v1127_v18  ;;  %976 = vmatprep.subr.bf16.mxu1 %v1331_v0 }
  0x88   : > { %410 = vmatpush1.bf16.msra.mxu0 %v1129_v20  ;;  %977 = vmatpush3.bf16.msra.mxu1 %v1136_v24 }
  0x89   : > { %411 = vmatprep.subr.bf16.mxu0 %v1131_v21  ;;  %978 = vmatprep.subr.bf16.mxu1 %v1331_v0 }
  0x8c   : > { %412 = vmatpush1.bf16.msra.mxu0 %v1133_v23  ;;  %979 = vmatpush3.bf16.msra.mxu1 %v1137_v26 }
  0x8d   : > { %996 = vmatprep.subr.bf16.mxu0 %v1331_v0  ;;  %984 = vmatprep.subr.bf16.mxu1 %v1331_v0 }
  0x8f   : > { %430 = vmatmul.mubr.bf16.vlgmr.msra.gmra.mrb[0].mxu0 %v288_v25  ;;  %981 = vmatmul.mubr.bf16.vlgmr.msra.gmra.mrb[0].mxu1 %v447_v27 }
  0x90   : > { %1012 = vmatprep.mubr.msk.bf16.mxu0 %vm1333_vm0, %v1331_v0  ;;  %986 = vmatprep.mubr.msk.bf16.mxu1 %vm1333_vm0, %v1331_v0 }
  0x91   : > { %997 = vmatpush3.bf16.msra.mxu0 %v1138_v63 }
  0x92   : > { %998 = vmatprep.subr.bf16.mxu0 %v1331_v0 }
  0x95   : > { %999 = vmatpush3.bf16.msra.mxu0 %v1139_v1 }
  0x96   : > { %1000 = vmatprep.subr.bf16.mxu0 %v1331_v0 }
  0x99   : > { %1001 = vmatpush3.bf16.msra.mxu0 %v1140_v2 }
  0x9a   : > { %1002 = vmatprep.subr.bf16.mxu0 %v1331_v0 }
  0x9d   : > { %1003 = vmatpush3.bf16.msra.mxu0 %v1141_v3 }
  0x9e   : > { %1004 = vmatprep.subr.bf16.mxu0 %v1331_v0 }
  0xa1   : > { %1005 = vmatpush3.bf16.msra.mxu0 %v1142_v4 }
  0xa2   : > { %1006 = vmatprep.subr.bf16.mxu0 %v1331_v0 }
  0xa5   : > { %1007 = vmatpush3.bf16.msra.mxu0 %v1143_v5 }
  0xa6   : > { %1008 = vmatprep.subr.bf16.mxu0 %v1331_v0 }
  0xa9   : > { %1009 = vmatpush3.bf16.msra.mxu0 %v1144_v6 }
  0xaa   : > { %1010 = vmatprep.subr.bf16.mxu0 %v1331_v0 }
  0xad   : > { %1011 = vmatpush3.bf16.msra.mxu0 %v1145_v11 }
 0x162   : > { %v431_v35 = vpop.f32.mrb[0].mxu0  ;;  %v553_v43 = vpop.f32.mrb[0].mxu1 }
 0x163   : > { %v432_v36 = vadd.f32 %v431_v35, %v310_v33  ;;  %v433_v37 = vpop.f32.mrb[1].mxu0  ;;  %v982_v44 = vpop.f32.mrb[1].mxu1  ;;  %v554_v48 = vadd.f32 %v919_v47, %v553_v43 }
 0x164   : > { %v434_v38 = vadd.f32 %v433_v37, %v314_v34  ;;  %v435_v39 = vpop.f32.mrb[2].mxu0  ;;  %v556_v45 = vpop.f32.mrb[2].mxu1 }
 0x165   : > { %v438_v40 = vpack.c.bf16 %v432_v36, %v432_v36  ;;  %v436_v41 = vpop.f32.mrb[3].mxu0  ;;  %v983_v46 = vpop.f32.mrb[3].mxu1  ;;  %v559_v50 = vpack.c.bf16 %v554_v48, %v554_v48 }
 0x166   : > { %v439_v42 = vpack.c.bf16 %v434_v38, %v434_v38 }
 0x167   : > { %440 = vst [vmem:[#allocation2] sm:$0xf] %v438_v40 }
 0x168   : > { %441 = vst [vmem:[#allocation3] sm:$0xf] %v439_v42 }
 0x16e   : > { %v560_v49 = vld [vmem:[#allocation2] sm:$0xf] }
 0x16f   : > { %985 = vmatpush3.bf16.xpose.msra.mxu1 %v560_v49  ;;  %v614_v51 = vld [vmem:[#allocation3] sm:$0xf] }
 0x170   : > { %990 = vmatprep.subr.bf16.mxu1 %v1331_v0  ;;  %v620_v52 = vsel %vm618_vm1, %v614_v51, 0 }
 0x176   : > { %987 = vmatmul.mubr.bf16.vlgmr.msra.gmra.mrb[4].mxu1 %v559_v50 }
 0x177   : > { %991 = vmatpush3.bf16.msra.mxu1 %v620_v52  ;;  %992 = vmatprep.mubr.msk.bf16.mxu1 %vm1333_vm0, %v1331_v0  ;;  %v929_v0 = vld [vmem:[%s1662_s4] ss:$0 sm:$0xff] }
 0x249   : > { %v595_v53 = vpop.f32.mrb[4].mxu1 }
 0x24a   : > { %v988_v54 = vpop.f32.mrb[5].mxu1  ;;  %v602_v55 = vsel %vm601_vm2, %v595_v53, -inf }
 0x24b   : > { %603 = vmax.xlane.f32.xlu0 %v602_v55  ;;  %v598_v56 = vpop.f32.mrb[6].mxu1 }
 0x24c   : > { %v989_v57 = vpop.f32.mrb[7].mxu1 }
 0x2d8   : > { %v604_v58 = vpop.xlane.xlu0 %603 }
 0x2d9   : > { %v605_v59 = vsub.f32 %v595_v53, %v604_v58 }
 0x2db   : > { %v606_v60 = vmul.f32 1.442695, %v605_v59 }
 0x2dd   : > { %1146 = vpow2.f32 %v606_v60 }
 0x2e7   : > { %v1147_v61 = vpop.eup %1146 }
 0x2e8   : > { %v608_v62 = vsel %vm601_vm2, %v1147_v61, 0.0 }
 0x2e9   : > { %609 = vadd.xlane.f32.xlu0 %v608_v62 }
 0x376   : > { %v610_v7 = vpop.xlane.xlu0 %609 }
 0x377   : > { %1148 = vrcp.f32 %v610_v7 }
 0x381   : > { %v1149_v8 = vpop.eup %1148 }
 0x382   : > { %v612_v9 = vmul.f32 %v1149_v8, %v1147_v61 }
 0x384   : > { %v613_v10 = vpack.c.bf16 %v612_v9, %v612_v9 }
 0x386   : > { %993 = vmatmul.mubr.msk.bf16.vlgmr.msra.gmra.mrb[8].mxu1 %vm601_vm2, %v613_v10 }
 0x459   : > { %v656_v12 = vpop.f32.mrb[8].mxu1 }
 0x45a   : > { %v662_v13 = vpack.c.bf16 %v656_v12, %v656_v12  ;;  %v994_v14 = vpop.f32.mrb[9].mxu1 }
 0x45b   : > { %v659_v15 = vpop.f32.mrb[10].mxu1 }
 0x45c   : > { %v995_v16 = vpop.f32.mrb[11].mxu1  ;;  %1013 = vmatmul.mubr.bf16.vlgmr.msra.gmra.mrb[4].mxu0 %v662_v13 }
 0x52f   : > { %v768_v17 = vpop.f32.mrb[4].mxu0 }
 0x530   : > { %v769_v18 = vadd.f32 %v929_v0, %v768_v17  ;;  %v1014_v19 = vpop.f32.mrb[5].mxu0 }
 0x531   : > { %v771_v20 = vpop.f32.mrb[6].mxu0 }
 0x532   : > { %774 = vst [vmem:[%s282_s27] sm:$0xff] %v769_v18  ;;  %v1015_v21 = vpop.f32.mrb[7].mxu0 }
 0x533   : > { %1249 = shalt.err (!%p1246_p11)
}
 0x534   : > { %s1250_s13 = scalar_lea.hbm %s1609_s24, 128  ;;  %s1254_s9 = scalar_lea.hbm %s1663_s5, 256 }
 0x535   : > { %p1251_p0 = scmp.ne.s32.totalorder %s1609_s24, %s1250_s13  ;;  %p1255_p6 = scmp.lt.u32.totalorder %s1609_s24, %s1663_s5 }
 0x536   : > { %p1256_p7 = scmp.lt.u32.totalorder %s1254_s9, %s1250_s13  ;;  %p1258_p8 = scmp.lt.u32.totalorder %s1250_s13, %s1609_s24 }
 0x537   : > { %p1252_p4 = pnand %p1251_p0, %p1678_p12 }
 0x538   : > { %p1257_p2 = por %p1256_p7, %p1255_p6 }
 0x539   : > { %p1253_p13 = pneg %p1252_p4 }
 0x53a   : > { %p1259_p1 = por %p1258_p8, %p1257_p2 }
 0x53c   : > { %p1260_p10 = pnand %p1259_p1, %p1253_p13 }
 0x53e   : > { %1263 = shalt.err (!%p1260_p10)
}
 0x53f   : > { %1026 = dma.vmem_to_hbm [thread:$0]  (%p1678_p12), %s1611_s8, 128, %s1609_s24, %s776_s7  }
 0x540 PF: > { %s802_s27 = sand.u32 1, %s1302_s18   ;;  %p1679_p3 = scmp.ne.s32.totalorder %s1671_s29, 0 }
 0x541   : > { %p1680_p5 = scmp.ge.s32.totalorder %s1322_s23, 2  ;;  %s803_s10 = scalar_lea.sflag [#allocation6], %s802_s27 }
 0x543   : > { %p1040_p9 = pnand %p1680_p5, %p1679_p3 }
 0x545   : > { %1297 = dma.done.wait (!%p1040_p9), %s803_s10, 128  }
 0x546   : > { %1299 = vsyncadd (!%p1040_p9), %s803_s10, 4294967168  ;;  %s22_s23 = sadd.s32 1, %s1322_s23   ;;  %s1681_s18 = smov %s1306_s19 }
 0x547   : > { %p19_p11 = scmp.ge.s32.totalorder %s22_s23, 4   ;;  %s1682_s19 = smov %s1310_s20 }
 0x548   : > { %s1683_s20 = smov %s1507_s17  ;;  %s1684_s21 = smov %s1318_s22 }
 0x549   : > { %s1685_s22 = smov %s1687_s12  ;;  %21 = sbr.rel (!%p19_p11) target bundleno = 7 (0x7), region = 98 }
 0x550   :  { %808 = vsyncpa [#allocation5], 1 }
 0x551   :  { %810 = vsyncpa [#allocation5 + $0x1], 1 }
 0x552   :  { %811 = vsyncpa [#allocation8], 1 }
 0x553   :  { %812 = vsyncpa [#allocation6], 1 }
 0x554   :  { %814 = vsyncpa [#allocation6 + $0x1], 1 }

</bundles_post_ra>
